<compile_context>
chip_gen: v7x
topology: tpu7x:2x2x1
jax: 0.10.0
libtpu: 0.0.40
codegen_flags: <defaults>
</compile_context>

<pallas_src>
import functools

import jax
import jax.numpy as jnp
from jax.experimental import pallas as pl
from jax.experimental.pallas import tpu as pltpu


def _cdiv(a, b):
    return (a + b - 1) // b


def _round_up(n, m):
    return _cdiv(n, m) * m


def ffnn_kernel(x_ref, w1_ref, b1_ref, w2_ref, b2_ref, o_ref):
    # Layer 1 (MXU): lane-dense [tbp, pack*F] @ blockdiag(W1) [pack*F, pack*H] -> [tbp, pack*H].
    h = jnp.dot(x_ref[...], w1_ref[...], preferred_element_type=jnp.float32)
    h = jnp.maximum(h + b1_ref[...], 0.0)                       # bias + ReLU (VPU)
    # Layer 2 (MXU): [tbp, pack*H] @ blockdiag(w2) [pack*H, pack] -> [tbp, pack] (8-lane output).
    y = jnp.dot(h, w2_ref[...], preferred_element_type=jnp.float32) + b2_ref[0, 0]
    # Exact sigmoid with one EUP push per vreg: sigmoid(y) = 0.5 * tanh(0.5 * y) + 0.5.
    o_ref[...] = (0.5 * jnp.tanh(0.5 * y) + 0.5).astype(o_ref.dtype)


@functools.partial(jax.jit, static_argnames=("tile_b",))
def simple_ffnn(x, w1, b1, w2, b2, *, tile_b=8192):
    """x: [B, F]; w1: [F, H]; b1: [1, H]; w2: [H, 1]; b2: [1, 1].

    Returns sigmoid(relu(x @ w1 + b1) @ w2 + b2) with shape [B, 1].
    """
    B, F = x.shape
    H = w1.shape[1]
    dtype = x.dtype

    # Lane-packing factor: fold `pack` consecutive batch rows into one 128-lane row.
    pack = 128 // F if (F <= 128 and 128 % F == 0) else 1
    gran = pack * 8                      # tb granularity so packed tiles stay 8-sublane aligned

    # Padding-aware tile selection (minimal zero-row work) + >=4 grid steps for large B so the
    # "parallel" batch axis can feed both TensorCores on v7x.
    n_tiles = _cdiv(B, tile_b)
    n_tiles = max(n_tiles, min(4, max(1, B // 1024)))
    tb = _round_up(_cdiv(B, n_tiles), gran)
    b_pad = n_tiles * tb
    tbp = tb // pack

    if b_pad != B:
        x = jnp.pad(x, ((0, b_pad - B), (0, 0)))
    # Free, contiguous reshape: packed row p holds original rows p*pack .. p*pack + pack-1.
    x_packed = x.reshape(b_pad // pack, pack * F)

    # Block-diagonal weight replicas so all `pack` packed sub-rows go through one matmul.
    eye = jnp.eye(pack, dtype=dtype)
    w1_blk = jnp.kron(eye, w1)                         # [pack*F, pack*H]
    w2_blk = jnp.kron(eye, w2)                         # [pack*H, pack]
    b1_tiled = jnp.tile(b1.reshape(1, H), (1, pack))   # [1, pack*H]
    b2_2d = b2.reshape(1, 1)                           # scalar bias -> SMEM

    itemsize = jnp.dtype(dtype).itemsize
    cost = pl.CostEstimate(
        flops=2 * b_pad * pack * F * H + 2 * b_pad * pack * H,   # actual block-diag MXU work
        transcendentals=b_pad,                                   # one tanh per row
        bytes_accessed=(b_pad * F + (pack * F) * (pack * H) + pack * H
                        + (pack * H) * pack + 1 + b_pad) * itemsize,
    )

    out = pl.pallas_call(
        ffnn_kernel,
        out_shape=jax.ShapeDtypeStruct((b_pad // pack, pack), dtype),
        grid=(n_tiles,),
        in_specs=[
            pl.BlockSpec((tbp, pack * F), lambda i: (i, 0)),       # lane-dense x tile (pipelined)
            pl.BlockSpec((pack * F, pack * H), lambda i: (0, 0)),  # blockdiag(W1), VMEM-resident
            pl.BlockSpec((1, pack * H), lambda i: (0, 0)),         # tiled b1, VMEM-resident
            pl.BlockSpec((pack * H, pack), lambda i: (0, 0)),      # blockdiag(w2), VMEM-resident
            pl.BlockSpec(memory_space=pltpu.MemorySpace.SMEM),     # b2 scalar in SMEM
        ],
        out_specs=pl.BlockSpec((tbp, pack), lambda i: (i, 0)),
        compiler_params=pltpu.CompilerParams(
            dimension_semantics=("parallel",),        # shard batch tiles across TCs (v7x megacore)
            vmem_limit_bytes=32 * 1024 * 1024,        # v7x-safe; packed tiles are well under this
        ),
        cost_estimate=cost,
    )(x_packed, w1_blk, b1_tiled, w2_blk, b2_2d)

    # Free, contiguous reshape back to one logit per row; drop padded rows.
    return out.reshape(b_pad, 1)[:B]


def init_params(key, n_features, hidden_dim=32, dtype=jnp.float32):
    # Deterministic init mimicking nn.Linear's uniform(-1/sqrt(fan_in), 1/sqrt(fan_in)).
    k1, k2, k3, k4 = jax.random.split(key, 4)
    bound1 = 1.0 / jnp.sqrt(n_features)
    bound2 = 1.0 / jnp.sqrt(hidden_dim)
    w1 = jax.random.uniform(k1, (n_features, hidden_dim), dtype, -bound1, bound1)
    b1 = jax.random.uniform(k2, (1, hidden_dim), dtype, -bound1, bound1)
    w2 = jax.random.uniform(k3, (hidden_dim, 1), dtype, -bound2, bound2)
    b2 = jax.random.uniform(k4, (1, 1), dtype, -bound2, bound2)
    return w1, b1, w2, b2


if __name__ == "__main__":
    n_features, hidden_dim = 16, 32
    key = jax.random.PRNGKey(0)
    kx_a, kx_b, kx_c, kp = jax.random.split(key, 4)
    w1, b1, w2, b2 = init_params(kp, n_features, hidden_dim)

    # batch=8: single small tile; batch=300: non-divisible (padding path, pads to 320 not 512);
    # batch=2048: multi-step grid (2 tiles) exercising the pipelined "parallel" batch axis.
    for batch, kx in ((8, kx_a), (300, kx_b), (2048, kx_c)):
        x = jax.random.normal(kx, (batch, n_features), dtype=jnp.float32)
        out = jax.block_until_ready(simple_ffnn(x, w1, b1, w2, b2))

        ref = jax.nn.sigmoid(jnp.maximum(x @ w1 + b1, 0.0) @ w2 + b2)
        assert out.shape == (batch, 1)
        # Sigmoid is now exact (tanh form); remaining diff is only default-precision MXU passes.
        assert jnp.allclose(out, ref, atol=2e-3, rtol=2e-3), (
            batch, float(jnp.max(jnp.abs(out - ref))))

    print("KERNEL_OK")
</pallas_src>

<mosaic_0001>
module attributes {stable_mosaic.version = 11 : i64} {
  func.func @ffnn_kernel(%arg0: i32, %arg1: memref<8x128xf32, #tpu.memory_space<vmem>>, %arg2: memref<128x256xf32, #tpu.memory_space<vmem>>, %arg3: memref<1x256xf32, #tpu.memory_space<vmem>>, %arg4: memref<256x8xf32, #tpu.memory_space<vmem>>, %arg5: memref<1x1xf32, #tpu.memory_space<smem>>, %arg6: memref<8x8xf32, #tpu.memory_space<vmem>>) attributes {dimension_semantics = [#tpu.dimension_semantics<parallel>], iteration_bounds = array<i64: 1>, scalar_prefetch = 0 : i64, scratch_operands = 0 : i64, tpu.core_type = #tpu.core_type<tc>, window_params = [{transform_indices = @transform_0, window_bounds = array<i64: 8, 128>}, {pipeline_mode = #tpu.pipeline_mode<synchronous>, transform_indices = @transform_1, window_bounds = array<i64: 128, 256>}, {pipeline_mode = #tpu.pipeline_mode<synchronous>, transform_indices = @transform_2, window_bounds = array<i64: 1, 256>}, {pipeline_mode = #tpu.pipeline_mode<synchronous>, transform_indices = @transform_3, window_bounds = array<i64: 256, 8>}, {transform_indices = @transform_4, window_bounds = array<i64: 1, 1>}, {transform_indices = @transform_5, window_bounds = array<i64: 8, 8>}]} {
    %c0 = arith.constant 0 : index
    %c0_0 = arith.constant 0 : index
    %0 = vector.load %arg1[%c0, %c0_0] : memref<8x128xf32, #tpu.memory_space<vmem>>, vector<8x128xf32>
    %c0_1 = arith.constant 0 : index
    %c0_2 = arith.constant 0 : index
    %1 = vector.load %arg2[%c0_1, %c0_2] : memref<128x256xf32, #tpu.memory_space<vmem>>, vector<128x256xf32>
    %cst = arith.constant dense<0.000000e+00> : vector<8x256xf32>
    %2 = tpu.matmul %0, %1, %cst {dimension_numbers = #tpu.dot_dimension_numbers<[1], [0], [0], [1], [0, 0, 1, 1], [], []>} : vector<8x128xf32>, vector<128x256xf32>, vector<8x256xf32> -> vector<8x256xf32>
    %c0_3 = arith.constant 0 : index
    %c0_4 = arith.constant 0 : index
    %3 = vector.load %arg3[%c0_3, %c0_4] : memref<1x256xf32, #tpu.memory_space<vmem>>, vector<1x256xf32>
    %4 = vector.broadcast %3 : vector<1x256xf32> to vector<8x256xf32>
    %5 = arith.addf %2, %4 : vector<8x256xf32>
    %cst_5 = arith.constant 0.000000e+00 : f32
    %6 = vector.broadcast %cst_5 : f32 to vector<8x256xf32>
    %7 = arith.maximumf %5, %6 : vector<8x256xf32>
    %c0_6 = arith.constant 0 : index
    %c0_7 = arith.constant 0 : index
    %8 = vector.load %arg4[%c0_6, %c0_7] : memref<256x8xf32, #tpu.memory_space<vmem>>, vector<256x8xf32>
    %cst_8 = arith.constant dense<0.000000e+00> : vector<8x8xf32>
    %9 = tpu.matmul %7, %8, %cst_8 {dimension_numbers = #tpu.dot_dimension_numbers<[1], [0], [0], [1], [0, 0, 1, 1], [], []>} : vector<8x256xf32>, vector<256x8xf32>, vector<8x8xf32> -> vector<8x8xf32>
    %c0_9 = arith.constant 0 : index
    %c0_10 = arith.constant 0 : index
    %10 = memref.load %arg5[%c0_9, %c0_10] : memref<1x1xf32, #tpu.memory_space<smem>>
    %11 = vector.broadcast %10 : f32 to vector<8x8xf32>
    %12 = arith.addf %9, %11 : vector<8x8xf32>
    %cst_11 = arith.constant 5.000000e-01 : f32
    %13 = vector.broadcast %cst_11 : f32 to vector<8x8xf32>
    %14 = arith.mulf %13, %12 : vector<8x8xf32>
    %15 = math.tanh %14 : vector<8x8xf32>
    %cst_12 = arith.constant 5.000000e-01 : f32
    %16 = vector.broadcast %cst_12 : f32 to vector<8x8xf32>
    %17 = arith.mulf %16, %15 : vector<8x8xf32>
    %cst_13 = arith.constant 5.000000e-01 : f32
    %18 = vector.broadcast %cst_13 : f32 to vector<8x8xf32>
    %19 = arith.addf %17, %18 : vector<8x8xf32>
    %c0_14 = arith.constant 0 : index
    %c0_15 = arith.constant 0 : index
    %20 = vector.load %arg6[%c0_14, %c0_15] : memref<8x8xf32, #tpu.memory_space<vmem>>, vector<8x8xf32>
    tpu.vector_store %arg6[%c0_14, %c0_15], %19 {strides = array<i32>} : memref<8x8xf32, #tpu.memory_space<vmem>>, vector<8x8xf32>,
    return
  }
  func.func @transform_0(%arg0: i32) -> (i32, i32) {
    %c0_i32 = arith.constant 0 : i32
    %c0_i32_0 = arith.constant 0 : i32
    return %arg0, %c0_i32 : i32, i32
  }
  func.func @transform_1(%arg0: i32) -> (i32, i32) {
    %c0_i32 = arith.constant 0 : i32
    %c0_i32_0 = arith.constant 0 : i32
    %c0_i32_1 = arith.constant 0 : i32
    return %c0_i32, %c0_i32_0 : i32, i32
  }
  func.func @transform_2(%arg0: i32) -> (i32, i32) {
    %c0_i32 = arith.constant 0 : i32
    %c0_i32_0 = arith.constant 0 : i32
    %c0_i32_1 = arith.constant 0 : i32
    return %c0_i32, %c0_i32_0 : i32, i32
  }
  func.func @transform_3(%arg0: i32) -> (i32, i32) {
    %c0_i32 = arith.constant 0 : i32
    %c0_i32_0 = arith.constant 0 : i32
    %c0_i32_1 = arith.constant 0 : i32
    return %c0_i32, %c0_i32_0 : i32, i32
  }
  func.func @transform_4(%arg0: i32) -> (i32, i32) {
    %c0_i32 = arith.constant 0 : i32
    %c0_i32_0 = arith.constant 0 : i32
    %c0_i32_1 = arith.constant 0 : i32
    return %c0_i32, %c0_i32_0 : i32, i32
  }
  func.func @transform_5(%arg0: i32) -> (i32, i32) {
    %c0_i32 = arith.constant 0 : i32
    %c0_i32_0 = arith.constant 0 : i32
    return %arg0, %c0_i32 : i32, i32
  }
}

</mosaic_0001>

<bundles_post_ra>
// kernel: simple_ffnn.1
= control target key start
LH: loop header
LB: loop body
LE: loop exit
PB: predicated region body
PF: predicated region fallthrough
CT: control target
= control target key end

     0   :  { %v355_v3 = vmov 0.0   ;;  %vm247_vm0 = vcmask 64512   ;;  %s590_s1 = inlined_call_operand.vmem [shape: f32[128,256], index: 1, kind: input, shape index: {}]   ;;  %s591_s3 = inlined_call_operand.vmem [shape: f32[256,8], index: 3, kind: input, shape index: {}]   ;;  %s592_s0 = inlined_call_operand.vmem [shape: f32[8,128], index: 0, kind: input, shape index: {}]   ;;  %s593_s2 = inlined_call_operand.vmem [shape: f32[1,256], index: 2, kind: input, shape index: {}]   ;;  %s594_s4 = inlined_call_operand.<no memory space> [shape: f32[1,1], index: 4, kind: input, shape index: {}]   ;;  %s595_s5 = inlined_call_operand.vmem [shape: f32[8,8], index: 5, kind: output, shape index: {}]  }
   0x1   :  { %v23_v0 = vld [vmem:[%s590_s1 + $0x8] sm:$0xff]  ;;  %v25_v1 = vld [vmem:[%s590_s1 + $0x18] sm:$0xff]  ;;  %v22_v2 = vld [vmem:[%s590_s1] sm:$0xff]  ;;  %130 = vmatprep.mubr.f32.mxu0 %v355_v3 }
   0x2   :  { %v288_v4 = vpack.c.bf16 %v25_v1, %v23_v0  ;;  %v24_v5 = vld [vmem:[%s590_s1 + $0x10] sm:$0xff]  ;;  %v27_v6 = vld [vmem:[%s590_s1 + $0x28] sm:$0xff]  ;;  %v29_v7 = vld [vmem:[%s590_s1 + $0x38] sm:$0xff] }
   0x3   :  { %v290_v8 = vpack.c.bf16 %v24_v5, %v22_v2  ;;  %v292_v9 = vpack.c.bf16 %v29_v7, %v27_v6  ;;  %v26_v10 = vld [vmem:[%s590_s1 + $0x20] sm:$0xff]  ;;  %v28_v11 = vld [vmem:[%s590_s1 + $0x30] sm:$0xff]  ;;  %v31_v12 = vld [vmem:[%s590_s1 + $0x48] sm:$0xff] }
   0x4   :  { %289 = vmatprep.subr.bf16.mxu0 %v288_v4  ;;  %v33_v13 = vld [vmem:[%s590_s1 + $0x58] sm:$0xff]  ;;  %v294_v14 = vpack.c.bf16 %v28_v11, %v26_v10  ;;  %v30_v16 = vld [vmem:[%s590_s1 + $0x40] sm:$0xff]  ;;  %v32_v17 = vld [vmem:[%s590_s1 + $0x50] sm:$0xff] }
   0x5   :  { %291 = vmatpush1.bf16.msra.mxu0 %v290_v8  ;;  %v296_v15 = vpack.c.bf16 %v33_v13, %v31_v12  ;;  %v35_v18 = vld [vmem:[%s590_s1 + $0x68] sm:$0xff]  ;;  %v37_v19 = vld [vmem:[%s590_s1 + $0x78] sm:$0xff]  ;;  %v298_v20 = vpack.c.bf16 %v32_v17, %v30_v16  ;;  %v34_v22 = vld [vmem:[%s590_s1 + $0x60] sm:$0xff] }
   0x6   :  { %293 = vmatprep.subr.bf16.mxu0 %v292_v9  ;;  %v300_v21 = vpack.c.bf16 %v37_v19, %v35_v18  ;;  %v36_v23 = vld [vmem:[%s590_s1 + $0x70] sm:$0xff]  ;;  %v39_v24 = vld [vmem:[%s590_s1 + $0x88] sm:$0xff]  ;;  %v41_v25 = vld [vmem:[%s590_s1 + $0x98] sm:$0xff] }
   0x7   :  { %v38_v26 = vld [vmem:[%s590_s1 + $0x80] sm:$0xff]  ;;  %v40_v27 = vld [vmem:[%s590_s1 + $0x90] sm:$0xff]  ;;  %v156_v29 = vld [vmem:[%s591_s3 + $0x88] sm:$0xff]  ;;  %v302_v31 = vpack.c.bf16 %v36_v23, %v34_v22  ;;  %v304_v36 = vpack.c.bf16 %v41_v25, %v39_v24 }
   0x8   :  { %v155_v28 = vld [vmem:[%s591_s3 + $0x80] sm:$0xff]  ;;  %v140_v33 = vld [vmem:[%s591_s3 + $0x8] sm:$0xff]  ;;  %v157_v34 = vld [vmem:[%s591_s3 + $0x90] sm:$0xff]  ;;  %v306_v46 = vpack.c.bf16 %v40_v27, %v38_v26 }
   0x9   :  { %295 = vmatpush1.bf16.msra.mxu0 %v294_v14  ;;  %v139_v30 = vld [vmem:[%s591_s3] sm:$0xff]  ;;  %v320_v32 = vpack.c.bf16 %v156_v29, %v155_v28  ;;  %v158_v35 = vld [vmem:[%s591_s3 + $0x98] sm:$0xff]  ;;  %v141_v39 = vld [vmem:[%s591_s3 + $0x10] sm:$0xff] }
   0xa   :  { %297 = vmatprep.subr.bf16.mxu0 %v296_v15  ;;  %v322_v37 = vpack.c.bf16 %v140_v33, %v139_v30  ;;  %v324_v38 = vpack.c.bf16 %v158_v35, %v157_v34  ;;  %v142_v40 = vld [vmem:[%s591_s3 + $0x18] sm:$0xff]  ;;  %v159_v41 = vld [vmem:[%s591_s3 + $0xa0] sm:$0xff]  ;;  %v43_v42 = vld [vmem:[%s590_s1 + $0xa8] sm:$0xff]  ;;  %v56_v34 = vlaneseq }
   0xb   :  { %v45_v43 = vld [vmem:[%s590_s1 + $0xb8] sm:$0xff]  ;;  %321 = vmatprep.subr.bf16.mxu1 %v320_v32  ;;  %v160_v44 = vld [vmem:[%s591_s3 + $0xa8] sm:$0xff]  ;;  %v326_v45 = vpack.c.bf16 %v142_v40, %v141_v39  ;;  %v42_v47 = vld [vmem:[%s590_s1 + $0xa0] sm:$0xff] }
   0xc   :  { %323 = vmatpush3.bf16.msra.mxu1 %v322_v37  ;;  %v328_v48 = vpack.c.bf16 %v160_v44, %v159_v41  ;;  %v143_v49 = vld [vmem:[%s591_s3 + $0x20] sm:$0xff]  ;;  %v144_v50 = vld [vmem:[%s591_s3 + $0x28] sm:$0xff]  ;;  %v308_v51 = vpack.c.bf16 %v45_v43, %v43_v42  ;;  %v44_v52 = vld [vmem:[%s590_s1 + $0xb0] sm:$0xff]  ;;  %v57_v35 = vshrl.u32 %v56_v34, 7 }
   0xd   :  { %299 = vmatpush1.bf16.msra.mxu0 %v298_v20  ;;  %325 = vmatprep.subr.bf16.mxu1 %v324_v38  ;;  %v161_v53 = vld [vmem:[%s591_s3 + $0xb0] sm:$0xff]  ;;  %v162_v54 = vld [vmem:[%s591_s3 + $0xb8] sm:$0xff]  ;;  %v47_v55 = vld [vmem:[%s590_s1 + $0xc8] sm:$0xff]  ;;  %v330_v57 = vpack.c.bf16 %v144_v50, %v143_v49  ;;  %v310_v58 = vpack.c.bf16 %v44_v52, %v42_v47 }
   0xe   :  { %301 = vmatprep.subr.bf16.mxu0 %v300_v21  ;;  %v49_v56 = vld [vmem:[%s590_s1 + $0xd8] sm:$0xff]  ;;  %v46_v59 = vld [vmem:[%s590_s1 + $0xc0] sm:$0xff]  ;;  %v332_v60 = vpack.c.bf16 %v162_v54, %v161_v53  ;;  %v145_v61 = vld [vmem:[%s591_s3 + $0x30] sm:$0xff]  ;;  %v62_v38 = vsub.s32 1, %v57_v35 }
   0xf   :  { %v146_v62 = vld [vmem:[%s591_s3 + $0x38] sm:$0xff]  ;;  %v312_v63 = vpack.c.bf16 %v49_v56, %v47_v55  ;;  %v48_v0 = vld [vmem:[%s590_s1 + $0xd0] sm:$0xff]  ;;  %v163_v1 = vld [vmem:[%s591_s3 + $0xc0] sm:$0xff] }
  0x10   :  { %327 = vmatpush3.bf16.msra.mxu1 %v326_v45  ;;  %v164_v2 = vld [vmem:[%s591_s3 + $0xc8] sm:$0xff]  ;;  %v53_v4 = vld [vmem:[%s590_s1 + $0xf8] sm:$0xff]  ;;  %v334_v5 = vpack.c.bf16 %v146_v62, %v145_v61  ;;  %v314_v6 = vpack.c.bf16 %v48_v0, %v46_v59  ;;  %v50_v7 = vld [vmem:[%s590_s1 + $0xe0] sm:$0xff] }
  0x11   :  { %303 = vmatpush1.bf16.msra.mxu0 %v302_v31  ;;  %329 = vmatprep.subr.bf16.mxu1 %v328_v48  ;;  %v51_v3 = vld [vmem:[%s590_s1 + $0xe8] sm:$0xff]  ;;  %v336_v8 = vpack.c.bf16 %v164_v2, %v163_v1  ;;  %v147_v9 = vld [vmem:[%s591_s3 + $0x40] sm:$0xff]  ;;  %v52_v12 = vld [vmem:[%s590_s1 + $0xf0] sm:$0xff]  ;;  %v172_v48 = vstv %s594_s4 }
  0x12   :  { %305 = vmatprep.subr.bf16.mxu0 %v304_v36  ;;  %v148_v10 = vld [vmem:[%s591_s3 + $0x48] sm:$0xff]  ;;  %v316_v11 = vpack.c.bf16 %v53_v4, %v51_v3  ;;  %v165_v13 = vld [vmem:[%s591_s3 + $0xd0] sm:$0xff]  ;;  %v166_v14 = vld [vmem:[%s591_s3 + $0xd8] sm:$0xff]  ;;  %v318_v16 = vpack.c.bf16 %v52_v12, %v50_v7  ;;  %v58_v36 = vsub.s32 0, %v57_v35 }
  0x13   :  { %v338_v15 = vpack.c.bf16 %v148_v10, %v147_v9  ;;  %v340_v17 = vpack.c.bf16 %v166_v14, %v165_v13  ;;  %v149_v18 = vld [vmem:[%s591_s3 + $0x50] sm:$0xff]  ;;  %v150_v19 = vld [vmem:[%s591_s3 + $0x58] sm:$0xff]  ;;  %v167_v20 = vld [vmem:[%s591_s3 + $0xe0] sm:$0xff] }
  0x14   :  { %331 = vmatpush3.bf16.msra.mxu1 %v330_v57  ;;  %v168_v21 = vld [vmem:[%s591_s3 + $0xe8] sm:$0xff]  ;;  %v342_v22 = vpack.c.bf16 %v150_v19, %v149_v18  ;;  %v21_v23 = vld [vmem:[%s592_s0] sm:$0xff]  ;;  %v169_v28 = vld [vmem:[%s591_s3 + $0xf0] sm:$0xff] }
  0x15   :  { %307 = vmatpush1.bf16.msra.mxu0 %v306_v46  ;;  %333 = vmatprep.subr.bf16.mxu1 %v332_v60  ;;  %v344_v24 = vpack.c.bf16 %v168_v21, %v167_v20  ;;  %v151_v25 = vld [vmem:[%s591_s3 + $0x60] sm:$0xff]  ;;  %v152_v26 = vld [vmem:[%s591_s3 + $0x68] sm:$0xff]  ;;  %v170_v29 = vld [vmem:[%s591_s3 + $0xf8] sm:$0xff] }
  0x16   :  { %309 = vmatprep.subr.bf16.mxu0 %v308_v51  ;;  %v346_v27 = vpack.c.bf16 %v152_v26, %v151_v25  ;;  %v348_v30 = vpack.c.bf16 %v170_v29, %v169_v28  ;;  %v153_v31 = vld [vmem:[%s591_s3 + $0x70] sm:$0xff]  ;;  %v154_v32 = vld [vmem:[%s591_s3 + $0x78] sm:$0xff]  ;;  %v54_v37 = vld [vmem:[%s593_s2] sm:$0x3] }
  0x17   :  { %v350_v33 = vpack.c.bf16 %v154_v32, %v153_v31  ;;  %v59_v39 = vrot.slane %v54_v37, %v58_v36  ;;  %v63_v40 = vrot.slane %v54_v37, %v62_v38 }
  0x18   :  { %335 = vmatpush3.bf16.msra.mxu1 %v334_v5 }
  0x19   :  { %311 = vmatpush1.bf16.msra.mxu0 %v310_v58  ;;  %337 = vmatprep.subr.bf16.mxu1 %v336_v8 }
  0x1a   :  { %313 = vmatprep.subr.bf16.mxu0 %v312_v63 }
  0x1c   :  { %339 = vmatpush3.bf16.msra.mxu1 %v338_v15 }
  0x1d   :  { %315 = vmatpush1.bf16.msra.mxu0 %v314_v6  ;;  %341 = vmatprep.subr.bf16.mxu1 %v340_v17 }
  0x1e   :  { %317 = vmatprep.subr.bf16.mxu0 %v316_v11 }
  0x20   :  { %343 = vmatpush3.bf16.msra.mxu1 %v342_v22 }
  0x21   :  { %319 = vmatpush1.bf16.msra.mxu0 %v318_v16  ;;  %345 = vmatprep.subr.bf16.mxu1 %v344_v24 }
  0x24   :  { %131 = vmatmul.mubr.f32.vlgmr.msra.gmra.mrb[0].mxu0 %v21_v23  ;;  %347 = vmatpush3.bf16.msra.mxu1 %v346_v27 }
  0x25   :  { %349 = vmatprep.subr.bf16.mxu1 %v348_v30 }
  0x28   :  { %351 = vmatpush3.bf16.msra.mxu1 %v350_v33 }
  0xf7   :  { %v132_v41 = vpop.f32.mrb[0].mxu0 }
  0xf8   :  { %v133_v42 = vadd.f32 %v132_v41, %v59_v39  ;;  %v134_v43 = vpop.f32.mrb[1].mxu0 }
  0xf9   :  { %v135_v44 = vadd.f32 %v134_v43, %v63_v40 }
  0xfa   :  { %v137_v46 = vmax.f32 %v133_v42, 0.0 }
  0xfb   :  { %v138_v45 = vmax.f32 %v135_v44, 0.0 }
  0xfd   :  { %237 = vmatprep.mubr.f32.mxu1 %v138_v45 }
  0xfe   :  { %238 = vmatmul.mubr.f32.vlgmr.msra.gmra.mrb[0].mxu1 %v137_v46 }
 0x1d1   :  { %v285_v47 = vpop.f32.mrb[0].mxu1 }
 0x1d2   :  { %v286_v49 = vpop.f32.mrb[1].mxu1 }
 0x1d3   :  { %v287_v50 = vadd.f32 %v286_v49, %v285_v47 }
 0x1d5   :  { %v240_v51 = vadd.f32 %v287_v50, %v172_v48 }
 0x1d7   :  { %v243_v52 = vmul.f32 0.5, %v240_v51 }
 0x1d9   :  { %353 = vtanh.f32 %v243_v52 }
 0x1e3   :  { %v354_v53 = vpop.eup %353 }
 0x1e4   :  { %v245_v54 = vmul.f32 0.5, %v354_v53 }
 0x1e6   :  { %v246_v55 = vadd.f32 0.5, %v245_v54 }
 0x1e8   :  { %248 = vst.msk [vmem:[%s595_s5] sm:$0xff] %vm247_vm0, %v246_v55 }

</bundles_post_ra>
